<compile_context>
chip_gen: v7x
topology: tpu7x:2x2x1
jax: 0.10.0
libtpu: 0.0.40
codegen_flags: <defaults>
</compile_context>

<pallas_src>
import functools

import jax
import jax.numpy as jnp
from jax import lax
from jax.experimental import pallas as pl
from jax.experimental.pallas import tpu as pltpu

_VMEM = pl.BlockSpec(memory_space=pltpu.MemorySpace.VMEM)
_BN_EPS = 1e-5
_CONV3_CHUNK_ROWS = 256     # row-chunk for the fused conv3 epilogue


# ----------------------------------------------------------------------------
# Kernel 1: fused per-point MLP (3 layers) + max-pool over the point axis
# ----------------------------------------------------------------------------
def _point_mlp_max_kernel(x_ref, w1_ref, b1_ref, w2_ref, b2_ref, w3_ref, b3_ref,
                          o_ref, *, relu3, vpu_conv1):
    nt = pl.program_id(1)
    bf16 = jnp.bfloat16
    x = x_ref[0]          # (tile_n, d)   f32
    w1 = w1_ref[0]        # (d, C1)       f32

    # ---- conv1: K = d (2 or 3) -> d broadcast-FMAs on the VPU, f32 ----
    if vpu_conv1:
        h = b1_ref[...]                                   # (1, C1)
        for j in range(x.shape[1]):
            h = h + x[:, j:j + 1] * w1[j:j + 1, :]        # (tile_n, C1)
    else:
        h = jnp.dot(x.astype(bf16), w1.astype(bf16),
                    preferred_element_type=jnp.float32) + b1_ref[...]
    h = jnp.maximum(h, 0.0)

    # ---- conv2: bf16 operands on the MXU, f32 accumulate/bias/ReLU ----
    h = jnp.maximum(
        jnp.dot(h.astype(bf16), w2_ref[...],
                preferred_element_type=jnp.float32) + b2_ref[...],
        0.0)                                              # (tile_n, C2) f32

    # ---- conv3 fused epilogue: chunked matmul + bias + (ReLU) + running max ----
    # Avoids materializing the full (tile_n, C3) f32 result and re-reading it.
    tile_n = h.shape[0]
    C3 = o_ref.shape[-1]
    w3 = w3_ref[...]                                      # (C2, C3) bf16, resident
    b3 = b3_ref[...]                                      # (1, C3)  f32
    run = jnp.full((1, C3), -jnp.inf, jnp.float32)
    chunk = min(_CONV3_CHUNK_ROWS, tile_n)
    for s in range(0, tile_n, chunk):
        e = min(s + chunk, tile_n)
        yc = jnp.dot(h[s:e].astype(bf16), w3,
                     preferred_element_type=jnp.float32) + b3
        if relu3:
            yc = jnp.maximum(yc, 0.0)
        run = jnp.maximum(run, jnp.max(yc, axis=0, keepdims=True))

    # ---- accumulate the running max directly into the VMEM-resident output ----
    @pl.when(nt == 0)
    def _():
        o_ref[0] = run

    @pl.when(nt > 0)
    def _():
        o_ref[0] = jnp.maximum(o_ref[0], run)


def point_mlp_max(x, w1, b1, w2, b2, w3, b3, *, relu3, max_tile_n=1024,
                  vmem_limit_bytes=None, split_single_batch=True):
    """x: (B, N, d); w1: (1, d, C1) shared or (B, d, C1) per-batch. Returns (B, C3)."""
    B, N, d = x.shape
    Bw, dw, C1 = w1.shape
    assert dw == d and Bw in (1, B), (w1.shape, x.shape)
    C2, C3 = w2.shape[1], w3.shape[1]

    # 8-aligned point tile; pad N up to a multiple of it by duplicating the last
    # point (duplicates cannot change the max -> no in-kernel masking needed).
    max_tile_n = max(8, (max_tile_n // 8) * 8)
    tile_n = min(max_tile_n, -(-N // 8) * 8)

    # B == 1: split the point axis into two halves on the leading "parallel" grid
    # axis so both TensorCores are used on v7x; combined with one jnp.maximum below.
    split = split_single_batch and B == 1 and N > tile_n
    groups = 2 if split else 1

    n_pad = -(-N // (tile_n * groups)) * (tile_n * groups)
    if n_pad != N:
        pad = jnp.broadcast_to(x[:, -1:, :], (B, n_pad - N, d))
        x = jnp.concatenate([x, pad], axis=1)
    if split:
        x = x.reshape(B * groups, n_pad // groups, d)

    Bg, Ng = x.shape[0], x.shape[1]
    grid = (Bg, Ng // tile_n)
    w1_map = (lambda b, nt: (b, 0, 0)) if Bw == Bg else (lambda b, nt: (0, 0, 0))

    cp_kwargs = dict(dimension_semantics=("parallel", "arbitrary"))
    if vmem_limit_bytes is not None:
        cp_kwargs["vmem_limit_bytes"] = vmem_limit_bytes

    out = pl.pallas_call(
        functools.partial(_point_mlp_max_kernel, relu3=relu3, vpu_conv1=(d <= 8)),
        out_shape=jax.ShapeDtypeStruct((Bg, 1, C3), jnp.float32),
        grid_spec=pltpu.PrefetchScalarGridSpec(
            num_scalar_prefetch=0,
            grid=grid,
            in_specs=[
                pl.BlockSpec((1, tile_n, d), lambda b, nt: (b, nt, 0)),
                pl.BlockSpec((1, d, C1), w1_map),
                pl.BlockSpec((1, C1), lambda b, nt: (0, 0)),   # weights/biases:
                pl.BlockSpec((C1, C2), lambda b, nt: (0, 0)),  # constant block index
                pl.BlockSpec((1, C2), lambda b, nt: (0, 0)),   # => VMEM-resident
                pl.BlockSpec((C2, C3), lambda b, nt: (0, 0)),
                pl.BlockSpec((1, C3), lambda b, nt: (0, 0)),
            ],
            out_specs=pl.BlockSpec((1, 1, C3), lambda b, nt: (b, 0, 0)),
        ),
        compiler_params=pltpu.CompilerParams(**cp_kwargs),
    )(x, w1, b1.reshape(1, C1),
      w2.astype(jnp.bfloat16), b2.reshape(1, C2),
      w3.astype(jnp.bfloat16), b3.reshape(1, C3))

    out = out.reshape(Bg, C3)
    if split:
        out = jnp.max(out.reshape(B, groups, C3), axis=1)
    return out


# ----------------------------------------------------------------------------
# Kernel 2: fused 3-layer FC head (STN fc stack / classifier head), grid=()
# ----------------------------------------------------------------------------
def _head_mlp_kernel(*refs, has_extra, do_log_softmax):
    if has_extra:
        (x_ref, w1_ref, b1_ref, w2_ref, b2_ref, w3_ref, b3_ref,
         extra_ref, o_ref) = refs
    else:
        (x_ref, w1_ref, b1_ref, w2_ref, b2_ref, w3_ref, b3_ref, o_ref) = refs
        extra_ref = None
    bf16 = jnp.bfloat16

    h = jnp.maximum(
        jnp.dot(x_ref[...].astype(bf16), w1_ref[...],
                preferred_element_type=jnp.float32) + b1_ref[...], 0.0)
    h = jnp.maximum(
        jnp.dot(h.astype(bf16), w2_ref[...],
                preferred_element_type=jnp.float32) + b2_ref[...], 0.0)
    y = jnp.dot(h.astype(bf16), w3_ref[...],
                preferred_element_type=jnp.float32) + b3_ref[...]

    if extra_ref is not None:          # STN: add flattened identity
        y = y + extra_ref[...]
    if do_log_softmax:                 # classifier: log_softmax(dim=1), f32
        m = jnp.max(y, axis=1, keepdims=True)
        e = jnp.exp(y - m)
        y = y - (jnp.log(jnp.sum(e, axis=1, keepdims=True)) + m)
    o_ref[...] = y


def mlp_head(x, p1, p2, p3, *, extra=None, do_log_softmax=False):
    (w1, b1), (w2, b2), (w3, b3) = p1, p2, p3
    B = x.shape[0]
    n_out = w3.shape[1]
    ops = [x,
           w1.astype(jnp.bfloat16), b1.reshape(1, -1),
           w2.astype(jnp.bfloat16), b2.reshape(1, -1),
           w3.astype(jnp.bfloat16), b3.reshape(1, -1)]
    if extra is not None:
        ops.append(extra)
    return pl.pallas_call(
        functools.partial(_head_mlp_kernel, has_extra=extra is not None,
                          do_log_softmax=do_log_softmax),
        out_shape=jax.ShapeDtypeStruct((B, n_out), jnp.float32),
        in_specs=[_VMEM] * len(ops),
        out_specs=_VMEM,
    )(*ops)


# ----------------------------------------------------------------------------
# Deterministic synthetic parameters (BatchNorm eval-mode folded into weights)
# ----------------------------------------------------------------------------
def _dense_params(key, c_in, c_out, with_bn):
    ks = jax.random.split(key, 6)
    w = 0.1 * jax.random.normal(ks[0], (c_in, c_out), jnp.float32)
    b = 0.01 * jax.random.normal(ks[1], (c_out,), jnp.float32)
    if with_bn:
        gamma = 1.0 + 0.01 * jax.random.normal(ks[2], (c_out,), jnp.float32)
        beta = 0.01 * jax.random.normal(ks[3], (c_out,), jnp.float32)
        running_mean = 0.01 * jax.random.normal(ks[4], (c_out,), jnp.float32)
        running_var = 1.0 + 0.1 * jax.random.uniform(ks[5], (c_out,), jnp.float32)
        scale = gamma / jnp.sqrt(running_var + _BN_EPS)
        w = w * scale[None, :]
        b = (b - running_mean) * scale + beta
    return w, b


def init_params(key, d, k, d_feat, d_h1, d_h2, stn1, stn2, stn3):
    layer_defs = {
        # STNkd(k=d)
        "stn_conv1": (d, 64, True),
        "stn_conv2": (64, 128, True),
        "stn_conv3": (128, stn1, True),
        "stn_fc1": (stn1, stn2, True),
        "stn_fc2": (stn2, stn3, True),
        "stn_fc3": (stn3, d * d, False),
        # PointNetfeat
        "feat_conv1": (d, 64, True),
        "feat_conv2": (64, 128, True),
        "feat_conv3": (128, d_feat, True),
        # classifier head
        "cls_fc1": (d_feat, d_h1, True),
        "cls_fc2": (d_h1, d_h2, True),
        "cls_fc3": (d_h2, k, False),
    }
    keys = jax.random.split(key, len(layer_defs))
    return {
        name: _dense_params(kk, cin, cout, with_bn=bn)
        for kk, (name, (cin, cout, bn)) in zip(keys, layer_defs.items())
    }


# ----------------------------------------------------------------------------
# Forward pass: 5 fused pallas_calls total
# ----------------------------------------------------------------------------
def pointnet_cls_forward(x, params, *, max_tile_n=1024, vmem_limit_bytes=None):
    """x: (B, N, d) float32. Returns (log_probs (B,k), trans (B,d,d), None)."""
    B, N, d = x.shape

    # ---- STNkd(k=d): fused conv stack + maxpool, then fused fc head ----
    stn_w1, stn_b1 = params["stn_conv1"]
    stn_pool = point_mlp_max(x, stn_w1[None], stn_b1,
                             *params["stn_conv2"], *params["stn_conv3"],
                             relu3=True, max_tile_n=max_tile_n,
                             vmem_limit_bytes=vmem_limit_bytes)
    iden = jnp.eye(d, dtype=jnp.float32).reshape(1, d * d)
    trans2d = mlp_head(stn_pool, params["stn_fc1"], params["stn_fc2"],
                       params["stn_fc3"], extra=iden)
    trans = trans2d.reshape(B, d, d)

    # ---- PointNetfeat: fold the dxd transform into conv1 weights ----
    # torch.bmm(x, trans) followed by conv1:  (x @ trans) @ W1 == x @ (trans @ W1)
    fw1, fb1 = params["feat_conv1"]
    w1_fused = jnp.einsum("bij,jc->bic", trans, fw1,
                          precision=lax.Precision.HIGHEST)   # (B, d, 64) — tiny
    feat = point_mlp_max(x, w1_fused, fb1,
                         *params["feat_conv2"], *params["feat_conv3"],
                         relu3=False, max_tile_n=max_tile_n,
                         vmem_limit_bytes=vmem_limit_bytes)

    # ---- classifier head (fc1 -> fc2 -> fc3 -> log_softmax, one kernel) ----
    # TODO(synk): nn.Dropout(p=0.3) is eval-mode identity here (no train RNG drop).
    logp = mlp_head(feat, params["cls_fc1"], params["cls_fc2"], params["cls_fc3"],
                    do_log_softmax=True)

    trans_feat = None                                        # feature_transform=False
    return logp, trans, trans_feat


# ----------------------------------------------------------------------------
# Pure-JAX references.  bf16_mxu=True matches the kernel's explicit precision
# (bf16 MXU operands, f32 accumulation); bf16_mxu=False is full-f32 HIGHEST.
# ----------------------------------------------------------------------------
def _ref_forward(x, params, *, bf16_mxu=True):
    hp = lax.Precision.HIGHEST

    def mm(a, w, mxu=True):
        if bf16_mxu and mxu:
            return jnp.dot(a.astype(jnp.bfloat16), w.astype(jnp.bfloat16),
                           preferred_element_type=jnp.float32)
        return jnp.dot(a, w, precision=hp)

    def lin(h, p, relu=False, mxu=True):
        w, b = p
        y = mm(h, w, mxu=mxu) + b
        return jnp.maximum(y, 0.0) if relu else y

    B, N, d = x.shape
    h = x.reshape(B * N, d)
    h = lin(h, params["stn_conv1"], True, mxu=False)   # kernel keeps conv1 on VPU f32
    h = lin(h, params["stn_conv2"], True)
    h = lin(h, params["stn_conv3"], True)
    h = jnp.max(h.reshape(B, N, -1), axis=1)
    h = lin(h, params["stn_fc1"], True)
    h = lin(h, params["stn_fc2"], True)
    h = lin(h, params["stn_fc3"]) + jnp.eye(d, dtype=jnp.float32).reshape(1, d * d)
    trans = h.reshape(B, d, d)
    xt = jnp.einsum("bnd,bde->bne", x, trans, precision=hp)
    h = lin(xt.reshape(B * N, d), params["feat_conv1"], True, mxu=False)
    h = lin(h, params["feat_conv2"], True)
    h = lin(h, params["feat_conv3"])
    feat = jnp.max(h.reshape(B, N, -1), axis=1)
    h = lin(feat, params["cls_fc1"], True)
    h = lin(h, params["cls_fc2"], True)
    logits = lin(h, params["cls_fc3"])
    return jax.nn.log_softmax(logits, axis=1), trans


if __name__ == "__main__":
    # Small shapes consistent with PointNetCls(k=10, d=2), hidden sizes scaled down.
    B, N, d, k = 2, 20, 2, 10
    d_feat, d_h1, d_h2 = 256, 128, 64
    stn1, stn2, stn3 = 256, 128, 64

    key = jax.random.PRNGKey(0)
    kx, kp = jax.random.split(key)
    x = jax.random.normal(kx, (B, N, d), dtype=jnp.float32)
    params = init_params(kp, d, k, d_feat, d_h1, d_h2, stn1, stn2, stn3)

    # max_tile_n=8 with N=20 -> tile_n=8, N padded to 24 with duplicate points:
    # exercises padding + the multi-tile running-max reduction into the output block.
    logp, trans, trans_feat = pointnet_cls_forward(x, params, max_tile_n=8)
    jax.block_until_ready((logp, trans))

    assert logp.shape == (B, k) and logp.dtype == jnp.float32
    assert trans.shape == (B, d, d)
    assert trans_feat is None
    # log_softmax rows should sum (in prob space) to ~1
    assert bool(jnp.all(jnp.abs(jnp.sum(jnp.exp(logp), axis=1) - 1.0) < 1e-4))

    # Matched-precision reference (bf16 MXU operands, f32 accumulation): tight check.
    logp_ref, trans_ref = _ref_forward(x, params, bf16_mxu=True)
    assert bool(jnp.max(jnp.abs(trans - trans_ref)) < 5e-3)
    assert bool(jnp.max(jnp.abs(logp - logp_ref)) < 5e-3)

    # Full-f32 HIGHEST-precision reference: loose sanity bound on the bf16 error.
    logp_f32, trans_f32 = _ref_forward(x, params, bf16_mxu=False)
    assert bool(jnp.max(jnp.abs(trans - trans_f32)) < 5e-2)
    assert bool(jnp.max(jnp.abs(logp - logp_f32)) < 2e-1)

    # B == 1: exercises the point-axis split (2-way "parallel" axis for v7x megacore).
    logp1, trans1, _ = pointnet_cls_forward(x[:1], params, max_tile_n=8)
    jax.block_until_ready((logp1, trans1))
    logp1_ref, trans1_ref = _ref_forward(x[:1], params, bf16_mxu=True)
    assert logp1.shape == (1, k) and trans1.shape == (1, d, d)
    assert bool(jnp.max(jnp.abs(trans1 - trans1_ref)) < 5e-3)
    assert bool(jnp.max(jnp.abs(logp1 - logp1_ref)) < 5e-3)

    print("KERNEL_OK")
</pallas_src>

<mosaic_0001>
module attributes {stable_mosaic.version = 11 : i64} {
  func.func @_point_mlp_max_kernel(%arg0: i32, %arg1: i32, %arg2: memref<1x8x2xf32, #tpu.memory_space<vmem>>, %arg3: memref<1x2x64xf32, #tpu.memory_space<vmem>>, %arg4: memref<1x64xf32, #tpu.memory_space<vmem>>, %arg5: memref<64x128xbf16, #tpu.memory_space<vmem>>, %arg6: memref<1x128xf32, #tpu.memory_space<vmem>>, %arg7: memref<128x256xbf16, #tpu.memory_space<vmem>>, %arg8: memref<1x256xf32, #tpu.memory_space<vmem>>, %arg9: memref<1x1x256xf32, #tpu.memory_space<vmem>>) attributes {dimension_semantics = [#tpu.dimension_semantics<parallel>, #tpu.dimension_semantics<arbitrary>], iteration_bounds = array<i64: 2, 3>, scalar_prefetch = 0 : i64, scratch_operands = 0 : i64, tpu.core_type = #tpu.core_type<tc>, window_params = [{transform_indices = @transform_0, window_bounds = array<i64: 1, 8, 2>}, {pipeline_mode = #tpu.pipeline_mode<synchronous>, transform_indices = @transform_1, window_bounds = array<i64: 1, 2, 64>}, {pipeline_mode = #tpu.pipeline_mode<synchronous>, transform_indices = @transform_2, window_bounds = array<i64: 1, 64>}, {pipeline_mode = #tpu.pipeline_mode<synchronous>, transform_indices = @transform_3, window_bounds = array<i64: 64, 128>}, {pipeline_mode = #tpu.pipeline_mode<synchronous>, transform_indices = @transform_4, window_bounds = array<i64: 1, 128>}, {pipeline_mode = #tpu.pipeline_mode<synchronous>, transform_indices = @transform_5, window_bounds = array<i64: 128, 256>}, {pipeline_mode = #tpu.pipeline_mode<synchronous>, transform_indices = @transform_6, window_bounds = array<i64: 1, 256>}, {transform_indices = @transform_7, window_bounds = array<i64: 1, 1, 256>}]} {
    %c0 = arith.constant 0 : index
    %c0_0 = arith.constant 0 : index
    %c0_1 = arith.constant 0 : index
    %0 = vector.load %arg2[%c0, %c0_0, %c0_1] : memref<1x8x2xf32, #tpu.memory_space<vmem>>, vector<1x8x2xf32>
    %1 = vector.shape_cast %0 : vector<1x8x2xf32> to vector<8x2xf32>
    %c0_2 = arith.constant 0 : index
    %c0_3 = arith.constant 0 : index
    %c0_4 = arith.constant 0 : index
    %2 = vector.load %arg3[%c0_2, %c0_3, %c0_4] : memref<1x2x64xf32, #tpu.memory_space<vmem>>, vector<1x2x64xf32>
    %3 = vector.shape_cast %2 : vector<1x2x64xf32> to vector<2x64xf32>
    %c0_5 = arith.constant 0 : index
    %c0_6 = arith.constant 0 : index
    %4 = vector.load %arg4[%c0_5, %c0_6] : memref<1x64xf32, #tpu.memory_space<vmem>>, vector<1x64xf32>
    %5 = vector.extract_strided_slice %1 {offsets = [0, 0], sizes = [8, 1], strides = [1, 1]} : vector<8x2xf32> to vector<8x1xf32>
    %6 = vector.extract_strided_slice %3 {offsets = [0, 0], sizes = [1, 64], strides = [1, 1]} : vector<2x64xf32> to vector<1x64xf32>
    %7 = vector.broadcast %5 : vector<8x1xf32> to vector<8x64xf32>
    %8 = vector.broadcast %6 : vector<1x64xf32> to vector<8x64xf32>
    %9 = arith.mulf %7, %8 : vector<8x64xf32>
    %10 = vector.broadcast %4 : vector<1x64xf32> to vector<8x64xf32>
    %11 = arith.addf %10, %9 : vector<8x64xf32>
    %12 = vector.extract_strided_slice %1 {offsets = [0, 1], sizes = [8, 1], strides = [1, 1]} : vector<8x2xf32> to vector<8x1xf32>
    %13 = vector.extract_strided_slice %3 {offsets = [1, 0], sizes = [1, 64], strides = [1, 1]} : vector<2x64xf32> to vector<1x64xf32>
    %14 = vector.broadcast %12 : vector<8x1xf32> to vector<8x64xf32>
    %15 = vector.broadcast %13 : vector<1x64xf32> to vector<8x64xf32>
    %16 = arith.mulf %14, %15 : vector<8x64xf32>
    %17 = arith.addf %11, %16 : vector<8x64xf32>
    %cst = arith.constant 0.000000e+00 : f32
    %18 = vector.broadcast %cst : f32 to vector<8x64xf32>
    %19 = arith.maximumf %17, %18 : vector<8x64xf32>
    %20 = arith.truncf %19 : vector<8x64xf32> to vector<8x64xbf16>
    %c0_7 = arith.constant 0 : index
    %c0_8 = arith.constant 0 : index
    %21 = vector.load %arg5[%c0_7, %c0_8] : memref<64x128xbf16, #tpu.memory_space<vmem>>, vector<64x128xbf16>
    %cst_9 = arith.constant dense<0.000000e+00> : vector<8x128xf32>
    %22 = tpu.matmul %20, %21, %cst_9 {dimension_numbers = #tpu.dot_dimension_numbers<[1], [0], [0], [1], [0, 0, 1, 1], [], []>} : vector<8x64xbf16>, vector<64x128xbf16>, vector<8x128xf32> -> vector<8x128xf32>
    %c0_10 = arith.constant 0 : index
    %c0_11 = arith.constant 0 : index
    %23 = vector.load %arg6[%c0_10, %c0_11] : memref<1x128xf32, #tpu.memory_space<vmem>>, vector<1x128xf32>
    %24 = vector.broadcast %23 : vector<1x128xf32> to vector<8x128xf32>
    %25 = arith.addf %22, %24 : vector<8x128xf32>
    %cst_12 = arith.constant 0.000000e+00 : f32
    %26 = vector.broadcast %cst_12 : f32 to vector<8x128xf32>
    %27 = arith.maximumf %25, %26 : vector<8x128xf32>
    %c0_13 = arith.constant 0 : index
    %c0_14 = arith.constant 0 : index
    %28 = vector.load %arg7[%c0_13, %c0_14] : memref<128x256xbf16, #tpu.memory_space<vmem>>, vector<128x256xbf16>
    %c0_15 = arith.constant 0 : index
    %c0_16 = arith.constant 0 : index
    %29 = vector.load %arg8[%c0_15, %c0_16] : memref<1x256xf32, #tpu.memory_space<vmem>>, vector<1x256xf32>
    %cst_17 = arith.constant 0xFF800000 : f32
    %30 = vector.broadcast %cst_17 : f32 to vector<1x256xf32>
    %31 = arith.truncf %27 : vector<8x128xf32> to vector<8x128xbf16>
    %cst_18 = arith.constant dense<0.000000e+00> : vector<8x256xf32>
    %32 = tpu.matmul %31, %28, %cst_18 {dimension_numbers = #tpu.dot_dimension_numbers<[1], [0], [0], [1], [0, 0, 1, 1], [], []>} : vector<8x128xbf16>, vector<128x256xbf16>, vector<8x256xf32> -> vector<8x256xf32>
    %33 = vector.broadcast %29 : vector<1x256xf32> to vector<8x256xf32>
    %34 = arith.addf %32, %33 : vector<8x256xf32>
    %cst_19 = arith.constant 0.000000e+00 : f32
    %35 = vector.broadcast %cst_19 : f32 to vector<8x256xf32>
    %36 = arith.maximumf %34, %35 : vector<8x256xf32>
    %cst_20 = arith.constant dense<0xFF800000> : vector<256xf32>
    %37 = vector.multi_reduction <maximumf>, %36, %cst_20 [0] : vector<8x256xf32> to vector<256xf32>
    %38 = vector.shape_cast %37 : vector<256xf32> to vector<1x256xf32>
    %39 = arith.maximumf %30, %38 : vector<1x256xf32>
    %c0_i32 = arith.constant 0 : i32
    %40 = arith.cmpi eq, %arg1, %c0_i32 : i32
    %41 = arith.extui %40 : i1 to i32
    %c0_i32_21 = arith.constant 0 : i32
    %42 = arith.cmpi ne, %41, %c0_i32_21 : i32
    scf.if %42 {
      %c0_24 = arith.constant 0 : index
      %c0_25 = arith.constant 0 : index
      %c0_26 = arith.constant 0 : index
      %46 = vector.load %arg9[%c0_24, %c0_25, %c0_26] : memref<1x1x256xf32, #tpu.memory_space<vmem>>, vector<1x1x256xf32>
      %47 = vector.shape_cast %46 : vector<1x1x256xf32> to vector<1x256xf32>
      %48 = vector.shape_cast %39 : vector<1x256xf32> to vector<1x1x256xf32>
      tpu.vector_store %arg9[%c0_24, %c0_25, %c0_26], %48 {strides = array<i32>} : memref<1x1x256xf32, #tpu.memory_space<vmem>>, vector<1x1x256xf32>,
    } else {
    }
    %c0_i32_22 = arith.constant 0 : i32
    %43 = arith.cmpi sgt, %arg1, %c0_i32_22 : i32
    %44 = arith.extui %43 : i1 to i32
    %c0_i32_23 = arith.constant 0 : i32
    %45 = arith.cmpi ne, %44, %c0_i32_23 : i32
    scf.if %45 {
      %c0_24 = arith.constant 0 : index
      %c0_25 = arith.constant 0 : index
      %c0_26 = arith.constant 0 : index
      %46 = vector.load %arg9[%c0_24, %c0_25, %c0_26] : memref<1x1x256xf32, #tpu.memory_space<vmem>>, vector<1x1x256xf32>
      %47 = vector.shape_cast %46 : vector<1x1x256xf32> to vector<1x256xf32>
      %48 = arith.maximumf %47, %39 : vector<1x256xf32>
      %c0_27 = arith.constant 0 : index
      %c0_28 = arith.constant 0 : index
      %c0_29 = arith.constant 0 : index
      %49 = vector.load %arg9[%c0_27, %c0_28, %c0_29] : memref<1x1x256xf32, #tpu.memory_space<vmem>>, vector<1x1x256xf32>
      %50 = vector.shape_cast %49 : vector<1x1x256xf32> to vector<1x256xf32>
      %51 = vector.shape_cast %48 : vector<1x256xf32> to vector<1x1x256xf32>
      tpu.vector_store %arg9[%c0_27, %c0_28, %c0_29], %51 {strides = array<i32>} : memref<1x1x256xf32, #tpu.memory_space<vmem>>, vector<1x1x256xf32>,
    } else {
    }
    return
  }
  func.func @transform_0(%arg0: i32, %arg1: i32) -> (i32, i32, i32) {
    %c0_i32 = arith.constant 0 : i32
    %c0_i32_0 = arith.constant 0 : i32
    return %arg0, %arg1, %c0_i32 : i32, i32, i32
  }
  func.func @transform_1(%arg0: i32, %arg1: i32) -> (i32, i32, i32) {
    %c0_i32 = arith.constant 0 : i32
    %c0_i32_0 = arith.constant 0 : i32
    %c0_i32_1 = arith.constant 0 : i32
    %c0_i32_2 = arith.constant 0 : i32
    return %c0_i32, %c0_i32_0, %c0_i32_1 : i32, i32, i32
  }
  func.func @transform_2(%arg0: i32, %arg1: i32) -> (i32, i32) {
    %c0_i32 = arith.constant 0 : i32
    %c0_i32_0 = arith.constant 0 : i32
    %c0_i32_1 = arith.constant 0 : i32
    return %c0_i32, %c0_i32_0 : i32, i32
  }
  func.func @transform_3(%arg0: i32, %arg1: i32) -> (i32, i32) {
    %c0_i32 = arith.constant 0 : i32
    %c0_i32_0 = arith.constant 0 : i32
    %c0_i32_1 = arith.constant 0 : i32
    return %c0_i32, %c0_i32_0 : i32, i32
  }
  func.func @transform_4(%arg0: i32, %arg1: i32) -> (i32, i32) {
    %c0_i32 = arith.constant 0 : i32
    %c0_i32_0 = arith.constant 0 : i32
    %c0_i32_1 = arith.constant 0 : i32
    return %c0_i32, %c0_i32_0 : i32, i32
  }
  func.func @transform_5(%arg0: i32, %arg1: i32) -> (i32, i32) {
    %c0_i32 = arith.constant 0 : i32
    %c0_i32_0 = arith.constant 0 : i32
    %c0_i32_1 = arith.constant 0 : i32
    return %c0_i32, %c0_i32_0 : i32, i32
  }
  func.func @transform_6(%arg0: i32, %arg1: i32) -> (i32, i32) {
    %c0_i32 = arith.constant 0 : i32
    %c0_i32_0 = arith.constant 0 : i32
    %c0_i32_1 = arith.constant 0 : i32
    return %c0_i32, %c0_i32_0 : i32, i32
  }
  func.func @transform_7(%arg0: i32, %arg1: i32) -> (i32, i32, i32) {
    %c0_i32 = arith.constant 0 : i32
    %c0_i32_0 = arith.constant 0 : i32
    %c0_i32_1 = arith.constant 0 : i32
    return %arg0, %c0_i32, %c0_i32_0 : i32, i32, i32
  }
}

</mosaic_0001>

<bundles_post_ra>
// kernel: tpu_custom_call.1
= control target key start
LH: loop header
LB: loop body
LE: loop exit
PB: predicated region body
PF: predicated region fallthrough
CT: control target
= control target key end

     0   :  { %s1325_s0 = inlined_call_operand.vmem [shape: f32[2,24,2], index: 0, kind: input, shape index: {}]   ;;  %s1326_s1 = inlined_call_operand.vmem [shape: f32[1,2,64], index: 1, kind: input, shape index: {}]   ;;  %s1327_s2 = inlined_call_operand.vmem [shape: f32[1,64], index: 2, kind: input, shape index: {}]   ;;  %s1328_s3 = inlined_call_operand.vmem [shape: bf16[64,128], index: 3, kind: input, shape index: {}]   ;;  %s1329_s4 = inlined_call_operand.vmem [shape: f32[1,128], index: 4, kind: input, shape index: {}]   ;;  %s1330_s5 = inlined_call_operand.hbm [shape: bf16[128,256], index: 5, kind: input, shape index: {}]   ;;  %s1331_s6 = inlined_call_operand.vmem [shape: f32[1,256], index: 6, kind: input, shape index: {}]   ;;  %s1332_s7 = inlined_call_operand.hbm [shape: f32[2,1,256], index: 7, kind: output, shape index: {}]  }
   0x1   :  { %1339 = sst [smem:[#allocation11_spill]] %s1330_s5 }
   0x2   :  { %12 = vsyncpa [#allocation3], 0 }
   0x3   :  { %13 = vsyncpa [#allocation4], 0 }
   0x4   :  { %15 = vsyncpa [#allocation4 + $0x1], 0  ;;  %s1111_s24 = smov 0   ;;  %s1113_s25 = smov 0  }
   0x5   :  { %s1115_s26 = smov 0   ;;  %s1117_s27 = smov 0  }
   0x6   :  { %s1119_s28 = smov 0   ;;  %s1121_s29 = smov 0  }
   0x7   :  { %s1123_s30 = smov 0   ;;  %s1125_s8 = smov 0  }
   0x8 LB: > { %1340 = sst [smem:[#allocation8_spill]] %s1055_s30  ;;  %s755_s9 = sadd.s32 4294967295, %s1059_s8   ;;  %s1059_s8 = sphi %s1125_s8, %s21_s8   ;;  %s1055_s30 = sphi %s1123_s30, %s1355_s30   ;;  %s1051_s29 = sphi %s1121_s29, %s1360_s29   ;;  %s1047_s28 = sphi %s1119_s28, %s1353_s28   ;;  %s1043_s27 = sphi %s1117_s27, %s1359_s27   ;;  %s1039_s26 = sphi %s1115_s26, %s1358_s26   ;;  %s1035_s25 = sphi %s1113_s25, %s1357_s25   ;;  %s1031_s24 = sphi %s1111_s24, %s1356_s24  }
   0x9   : > { %s756_s10 = sadd.s32 4294967294, %s1059_s8   ;;  %s30_s11 = sadd.s32 1, %s1051_s29 }
   0xa   : > { %s33_s12 = sadd.s32 1, %s1055_s30  ;;  %p31_p0 = scmp.ge.s32.totalorder %s30_s11, 3 }
   0xb   : > { %s194_s13 = sadd.s32 1, %s1039_s26  ;;  %p204_p1 = scmp.ne.s32.totalorder %s1039_s26, %s1035_s25 }
   0xc   : > { %p205_p2 = scmp.eq.s32.totalorder %s755_s9, 5  ;;  %s1362_s11 = smov (%p31_p0, %s30_s11), 0 }
   0xd   : > { %1341 = sst [smem:[#allocation9_spill]] %s1362_s11  ;;  %s1364_s12 = smov (!%p31_p0, %s33_s12), %s1055_s30 }
   0xe   : > { %p1161_p3 = por %p205_p2, %p204_p1  ;;  %p210_p4 = scmp.ne.s32.totalorder %s1035_s25, %s1031_s24 }
   0xf   : > { %p35_p5 = scmp.ge.s32.totalorder %s1364_s12, 2  ;;  %p211_p6 = scmp.eq.s32.totalorder %s756_s10, 5 }
  0x10   : > { %s1342_s14 = scalar_select %p1161_p3, 1, 0 }
  0x11   : > { %p757_p7 = scmp.ge.s32.totalorder %s1059_s8, 1  ;;  %p218_p8 = scmp.lt.s32.totalorder %s1059_s8, 7 }
  0x12   : > { %s1366_s12 = smov (%p35_p5, %s1364_s12), 0  ;;  %p1171_p9 = por %p211_p6, %p210_p4 }
  0x13   : > { %1343 = sst [smem:[#allocation10_spill]] %s1366_s12  ;;  %p1175_p10 = pnand %p757_p7, %p218_p8 }
  0x14   : > { %s1344_s15 = scalar_select %p1171_p9, 1, 0 }
  0x15   : > { %s1345_s16 = scalar_select %p1175_p10, 1, 0 }
  0x16   : > { %s191_s17 = ssub.s32 %s1055_s30, %s1366_s12  ;;  %p819_p12 = pneg %p1175_p10 }
  0x17   : > { %p192_p11 = scmp.eq.s32.totalorder %s191_s17, 0  ;;  %p1183_p13 = scmp.eq.s32.totalorder %s755_s9, 0 }
  0x18   : > { %s1061_s20 = smov [#allocation2]   ;;  %s1348_s5 = sld [smem:[#allocation11_spill]] }
  0x19   : > { %s1346_s18 = scalar_select %p1183_p13, 1, 0 }
  0x1a   : > { %s1188_s19 = scalar_select %p192_p11, %s1039_s26, %s194_s13  }
  0x1b   : > { %s242_s21 = sshll.u32 %s1061_s20, 4  ;;  %p1192_p0 = pnand %p1183_p13, %p819_p12  ;;  %s243_s21 = int_to_ptr.vmem [resolvable:$true] %s242_s21 }
  0x1d   : > { %p935_p2 = pneg %p1192_p0 }
  0x1e   : > { %s933_s17 = scalar_lea.hbm %s1348_s5, 2048 }
  0x1f   : > { %p934_p1 = scmp.ne.s32.totalorder %s1348_s5, %s933_s17  ;;  %p940_p6 = scmp.lt.u32.totalorder %s933_s17, %s1348_s5 }
  0x21   : > { %p936_p4 = pnand %p935_p2, %p934_p1 }
  0x23   : > { %p937_p5 = pneg %p936_p4 }
  0x25   : > { %p942_p7 = pnand %p940_p6, %p937_p5 }
  0x27   : > { %945 = shalt.err (!%p942_p7)
}
  0x28   : > { %s946_s11 = scalar_lea.vmem %s243_s21, 2048  ;;  %p954_p9 = scmp.lt.s32.totalorder %s243_s21, %s243_s21 }
  0x29   : > { %p947_p8 = scmp.ne.s32.totalorder %s243_s21, %s946_s11  ;;  %p955_p3 = scmp.lt.s32.totalorder %s946_s11, %s946_s11 }
  0x2b   : > { %p949_p11 = pnand %p947_p8, %p935_p2  ;;  %p956_p13 = por %p955_p3, %p954_p9 }
  0x2d   : > { %p950_p12 = pneg %p949_p11 }
  0x2f   : > { %p957_p10 = pnand %p956_p13, %p950_p12 }
  0x31   : > { %960 = shalt.err (!%p957_p10)
}
  0x32   : > { %s1062_s12 = smov 128   ;;  %s1063_s23 = smov 8  }
  0x33   : > { %822 = dma.hbm_to_vmem [thread:$0]  (!%p1192_p0), %s1348_s5, 2048, %s243_s21, [#allocation3], %s1062_s12, %s1062_s12, %s1063_s23  }
  0x34   : > { %p1349_p1 = scmp.ne.s32.totalorder %s1345_s16, 0 }
  0x35   : > { %p1350_p4 = scmp.ne.s32.totalorder (!%p1349_p1), %s1346_s18, 0 }
  0x36   : > { %272 = sbr.rel (%p1349_p1) target bundleno = 707 (0x2c3), region = 48 }
  0x3d   : > { %1022 = dma.done.wait (%p1350_p4), [#allocation3], 2048  }
  0x3e   : > { %1024 = vsyncadd (%p1350_p4), [#allocation3], 4294965248  ;;  %p307_p3 = scmp.lt.s32.totalorder %s1047_s28, 1  ;;  %p309_p9 = scmp.lt.s32.totalorder %s1043_s27, 2  ;;  %v1064_v0 = vmov 0   ;;  %v1065_v1 = vmov 0.0   ;;  %v324_v21 = vlaneseq }
  0x3f   : > { %903 = vset.pattern.permute.xlu0 %v1064_v0  ;;  %s304_s11 = sand.u32 1, %s1035_s25   ;;  %573 = vmatprep.mubr.bf16.mxu1 %v1064_v0  ;;  %v905_v2 = vld [vmem:[%s1328_s3] sm:$0xff]   ;;  %v906_v4 = vld [vmem:[%s1328_s3 + $0x8] sm:$0xff]   ;;  %v1066_v5 = vmov 1   ;;  %v907_v6 = vld [vmem:[%s1328_s3 + $0x10] sm:$0xff]   ;;  %vm1067_vm0 = vmmov 0  }
  0x40   : > { %s308_s16 = scalar_select %p307_p3, %s1047_s28, 1  ;;  %800 = vmatprep.subr.bf16.mxu0 %v1065_v1  ;;  %v908_v7 = vld [vmem:[%s1328_s3 + $0x18] sm:$0xff]   ;;  %808 = vmatprep.mubr.msk.bf16.mxu0 %vm1067_vm0, %v1065_v1  ;;  %v909_v8 = vld [vmem:[#allocation2 + $0x4] ss:$8 sps:$4 sm:$0xff]   ;;  %v911_v9 = vld [vmem:[#allocation2] ss:$8 sps:$4 sm:$0xff]  }
  0x41   : > { %s310_s21 = scalar_select %p309_p9, %s1043_s27, 2  ;;  %801 = vmatpush3.bf16.msra.mxu0 %v905_v2  ;;  %v912_v10 = vld [vmem:[#allocation2 + $0x14] ss:$8 sps:$4 sm:$0xff]   ;;  %541 = vmatprep.subr.bf16.mxu1 %v909_v8  ;;  %v914_v11 = vld [vmem:[#allocation2 + $0x10] ss:$8 sps:$4 sm:$0xff]   ;;  %v1243_v22 = vshrl.u32 %v324_v21, 7 }
  0x42   : > { %s812_s22 = smul.u32 3, %s308_s16  ;;  %s1225_s18 = sshll.u32 %s304_s11, 1  ;;  %802 = vmatprep.subr.bf16.mxu0 %v1065_v1  ;;  %542 = vmatpush1.bf16.msra.mxu1 %v911_v9  ;;  %v915_v12 = vld [vmem:[#allocation2 + $0x24] ss:$8 sps:$4 sm:$0xff]   ;;  %v917_v13 = vld [vmem:[#allocation2 + $0x20] ss:$8 sps:$4 sm:$0xff]  }
  0x43   : > { %543 = vmatprep.subr.bf16.mxu1 %v912_v10  ;;  %v918_v14 = vld [vmem:[#allocation2 + $0x34] ss:$8 sps:$4 sm:$0xff]   ;;  %v920_v15 = vld [vmem:[#allocation2 + $0x30] ss:$8 sps:$4 sm:$0xff]   ;;  %v921_v16 = vld [vmem:[#allocation2 + $0x44] ss:$8 sps:$4 sm:$0xff]  }
  0x44   : > { %s312_s17 = sadd.s32 %s812_s22, %s310_s21  ;;  %v923_v17 = vld [vmem:[#allocation2 + $0x40] ss:$8 sps:$4 sm:$0xff]   ;;  %v924_v18 = vld [vmem:[#allocation2 + $0x54] ss:$8 sps:$4 sm:$0xff]   ;;  %v926_v19 = vld [vmem:[#allocation2 + $0x50] ss:$8 sps:$4 sm:$0xff]  }
  0x45   : > { %s763_s13 = sshll.u32 %s312_s17, 3  ;;  %803 = vmatpush3.bf16.msra.mxu0 %v906_v4  ;;  %v927_v20 = vld [vmem:[#allocation2 + $0x64] ss:$8 sps:$4 sm:$0xff]   ;;  %v326_v23 = vsub.s32 0, %v1243_v22  ;;  %v317_v24 = vld [vmem:[%s1326_s1] sm:$0x3] }
  0x46   : > { %s314_s9 = scalar_lea.vmem %s1325_s0, %s763_s13  ;;  %804 = vmatprep.subr.bf16.mxu0 %v1065_v1  ;;  %544 = vmatpush1.bf16.msra.mxu1 %v914_v11  ;;  %v342_v26 = vsub.s32 1, %v1243_v22  ;;  %v764_v30 = vld [vmem:[%s1327_s2] ss:$0 sm:$0xff]  ;;  %vm387_vm1 = vcmask 523264   ;;  %v930_v38 = vld [vmem:[#allocation2 + $0x74] ss:$8 sps:$4 sm:$0xff]  }
  0x47   : > { %v316_v3 = vld [vmem:[%s314_s9] sm:$0xff]  ;;  %545 = vmatprep.subr.bf16.mxu1 %v915_v12  ;;  %v327_v25 = vrot.slane %v317_v24, %v326_v23  ;;  %v932_v39 = vld [vmem:[#allocation2 + $0x70] ss:$8 sps:$4 sm:$0xff]   ;;  %s1260_s16 = scalar_lea.vmem [#allocation5], %s1225_s18  ;;  %p787_p10 = scmp.ne.s32.totalorder %s1043_s27, 0 }
  0x48   : > { %321 = vperm.xlu0 %903, %v316_v3   ;;  %v343_v29 = vrot.slane %v317_v24, %v342_v26  ;;  %v929_v37 = vld [vmem:[#allocation2 + $0x60] ss:$8 sps:$4 sm:$0xff]   ;;  %vm620_vm2 = vcmp.lt.s32.totalorder (!%p787_p10), %v324_v21, 256 }
  0x49   : > { %805 = vmatpush3.bf16.msra.mxu0 %v907_v6  ;;  %v765_v40 = vld [vmem:[%s1329_s4] ss:$0 sm:$0xff] }
  0x4a   : > { %806 = vmatprep.subr.bf16.mxu0 %v1065_v1  ;;  %546 = vmatpush1.bf16.msra.mxu1 %v917_v13  ;;  %v448_v48 = vld [vmem:[%s1331_s6] sm:$0x3] }
  0x4b   : > { %547 = vmatprep.subr.bf16.mxu1 %v918_v14  ;;  %v454_v49 = vrot.slane %v448_v48, %v326_v23  ;;  %v458_v50 = vrot.slane %v448_v48, %v342_v26 }
  0x4c   : > { %904 = vset.pattern.permute.xlu0 %v1066_v5 }
  0x4d   : > { %337 = vperm.xlu0 %904, %v316_v3   ;;  %807 = vmatpush3.bf16.msra.mxu0 %v908_v7  ;;  %v1068_v7 = vmov (!%p787_p10), 1966171168  }
  0x4e   : > { %548 = vmatpush1.bf16.msra.mxu1 %v920_v15  ;;  %v604_v8 = vunpack.c.l.s4 (!%p787_p10), %v1068_v7 }
  0x4f   : > { %549 = vmatprep.subr.bf16.mxu1 %v921_v16 }
  0x50   : > { %v605_v10 = vunpack.c.0.s8 (!%p787_p10), %v604_v8 }
  0x52   : > { %550 = vmatpush1.bf16.msra.mxu1 %v923_v17  ;;  %v608_v11 = vsub.s32 (!%p787_p10), %v605_v10, %v1243_v22 }
  0x53   : > { %551 = vmatprep.subr.bf16.mxu1 %v924_v18 }
  0x56   : > { %552 = vmatpush1.bf16.msra.mxu1 %v926_v19 }
  0x57   : > { %553 = vmatprep.subr.bf16.mxu1 %v927_v20 }
  0x5a   : > { %554 = vmatpush1.bf16.msra.mxu1 %v929_v37 }
  0x5b   : > { %555 = vmatprep.subr.bf16.mxu1 %v930_v38 }
  0x5e   : > { %556 = vmatpush1.bf16.msra.mxu1 %v932_v39 }
  0xc7   : > { %v322_v27 = vpop.permute.xlu0 %321 }
  0xc8   : > { %v328_v28 = vmul.f32 %v327_v25, %v322_v27 }
  0xca   : > { %v335_v32 = vadd.f32 %v764_v30, %v328_v28 }
  0xcc   : > { %v338_v31 = vpop.permute.xlu0 %337 }
  0xcd   : > { %v344_v33 = vmul.f32 %v343_v29, %v338_v31 }
  0xcf   : > { %v345_v34 = vadd.f32 %v344_v33, %v335_v32 }
  0xd1   : > { %v346_v35 = vmax.f32 %v345_v34, 0.0 }
  0xd3   : > { %v347_v36 = vpack.c.bf16 %v346_v35, %v346_v35 }
  0xd5   : > { %809 = vmatmul.mubr.msk.bf16.vlgmr.msra.gmra.mrb[0].mxu0 %vm387_vm1, %v347_v36 }
 0x1a8   : > { %v425_v41 = vpop.f32.mrb[0].mxu0 }
 0x1a9   : > { %v426_v42 = vadd.f32 %v765_v40, %v425_v41  ;;  %v810_v43 = vpop.f32.mrb[1].mxu0 }
 0x1aa   : > { %v428_v44 = vpop.f32.mrb[2].mxu0 }
 0x1ab   : > { %v431_v45 = vmax.f32 %v426_v42, 0.0  ;;  %v811_v46 = vpop.f32.mrb[3].mxu0 }
 0x1ad   : > { %v449_v47 = vpack.c.bf16 %v431_v45, %v431_v45 }
 0x1af   : > { %574 = vmatmul.mubr.bf16.vlgmr.msra.gmra.mrb[0].mxu1 %v449_v47 }
 0x282   : > { %v575_v51 = vpop.f32.mrb[0].mxu1 }
 0x283   : > { %v576_v52 = vadd.f32 %v575_v51, %v454_v49  ;;  %v577_v53 = vpop.f32.mrb[1].mxu1 }
 0x284   : > { %v578_v54 = vadd.f32 %v577_v53, %v458_v50  ;;  %v579_v55 = vpop.f32.mrb[2].mxu1 }
 0x285   : > { %v582_v56 = vmax.f32 %v576_v52, 0.0  ;;  %v580_v57 = vpop.f32.mrb[3].mxu1 }
 0x286   : > { %v583_v58 = vmax.f32 %v578_v54, 0.0 }
 0x287   : > { %v584_v59 = vrot.slane %v582_v56, 4 }
 0x288   : > { %v590_v60 = vrot.slane %v583_v58, 4 }
 0x289   : > { %v585_v61 = vmax.f32 %v582_v56, %v584_v59 }
 0x28a   : > { %v591_v62 = vmax.f32 %v583_v58, %v590_v60 }
 0x28b   : > { %v586_v63 = vrot.slane %v585_v61, 2 }
 0x28c   : > { %v592_v0 = vrot.slane %v591_v62, 2  ;;  %599 = sbr.rel (%p787_p10) target bundleno = 667 (0x29b), region = 56 }
 0x28d   : > { %v587_v1 = vmax.f32 %v585_v61, %v586_v63 }
 0x28e   : > { %v593_v2 = vmax.f32 %v591_v62, %v592_v0 }
 0x28f   : > { %v588_v3 = vrot.slane %v587_v1, 1 }
 0x290   : > { %v594_v4 = vrot.slane %v593_v2, 1 }
 0x291   : > { %v589_v5 = vmax.f32 %v587_v1, %v588_v3 }
 0x292   : > { %v595_v6 = vmax.f32 %v593_v2, %v594_v4 }
 0x294   : > { %v602_v9 = vcombine.low %v589_v5, %v595_v6 }
 0x296   : > { %v609_v12 = vrot.slane %v602_v9, %v608_v11 }
 0x298   : > { %v616_v13 = vrot.slane %v609_v12, %v608_v11 }
 0x29a   : > { %622 = vst.msk [vmem:[%s1260_s16] sm:$0x3] %vm620_vm2, %v616_v13 }
 0x29b PF: > { %p788_p13 = scmp.le.s32.totalorder %s1043_s27, 0 }
 0x29c   : > { %v1069_v14 = vmov (!%p788_p13), 1966171168   ;;  %v630_v16 = vcombine.low (!%p788_p13), %v589_v5, %v595_v6  ;;  %vm649_vm3 = vcmp.lt.s32.totalorder (!%p788_p13), %v324_v21, 256 }
 0x29d   : > { %626 = sbr.rel (%p788_p13) target bundleno = 682 (0x2aa), region = 60  ;;  %v632_v15 = vunpack.c.l.s4 (!%p788_p13), %v1069_v14 }
 0x29f   : > { %v633_v17 = vunpack.c.0.s8 (!%p788_p13), %v632_v15 }
 0x2a1   : > { %v636_v18 = vsub.s32 (!%p788_p13), %v633_v17, %v1243_v22  ;;  %v627_v20 = vld [vmem:[%s1260_s16] sm:$0x3] (!%p788_p13) }
 0x2a3   : > { %v637_v19 = vrot.slane (!%p788_p13), %v630_v16, %v636_v18 }
 0x2a5   : > { %v644_v23 = vrot.slane %v637_v19, %v636_v18 }
 0x2a7   : > { %v646_v24 = vmax.f32 %v627_v20, %v644_v23 }
 0x2a9   : > { %651 = vst.msk [vmem:[%s1260_s16] sm:$0x3] %vm649_vm3, %v646_v24 }
 0x2aa PF: > { %s794_s27 = sshll.u32 %s1047_s28, 5  ;;  %s667_s17 = sshll.u32 %s1260_s16, 4  ;;  %s668_s17 = int_to_ptr.vmem [resolvable:$true] %s667_s17 }
 0x2ab   : > { %s1275_s22 = scalar_lea.hbm %s1332_s7, %s794_s27  ;;  %s653_s5 = scalar_lea.sflag [#allocation4], %s304_s11 }
 0x2ac   : > { %s961_s30 = scalar_lea.vmem %s668_s17, 32  ;;  %p1351_p2 = scmp.ne.s32.totalorder %s1342_s14, 0 }
 0x2ad   : > { %p962_p0 = scmp.ne.s32.totalorder %s668_s17, %s961_s30  ;;  %s1070_s13 = smov [#allocation5]  }
 0x2ae   : > { %s965_s20 = sshll.u32 %s1070_s13, 4  ;;  %s966_s20 = int_to_ptr.vmem [resolvable:$false] %s965_s20 }
 0x2af   : > { %p963_p5 = pnand %p962_p0, %p1351_p2  ;;  %s967_s12 = scalar_lea.vmem %s966_s20, 64 }
 0x2b0   : > { %p968_p7 = scmp.lt.s32.totalorder %s668_s17, %s966_s20  ;;  %p969_p8 = scmp.lt.s32.totalorder %s967_s12, %s961_s30 }
 0x2b1   : > { %p964_p6 = pneg %p963_p5 }
 0x2b2   : > { %p970_p11 = por %p969_p8, %p968_p7 }
 0x2b4   : > { %p971_p12 = pnand %p970_p11, %p964_p6 }
 0x2b6   : > { %974 = shalt.err (!%p971_p12)
}
 0x2b7   : > { %s975_s28 = scalar_lea.hbm %s1275_s22, 32  ;;  %s979_s10 = scalar_lea.hbm %s1332_s7, 64 }
 0x2b8   : > { %p976_p1 = scmp.ne.s32.totalorder %s1275_s22, %s975_s28  ;;  %p980_p9 = scmp.lt.u32.totalorder %s1275_s22, %s1332_s7 }
 0x2b9   : > { %p981_p10 = scmp.lt.u32.totalorder %s979_s10, %s975_s28  ;;  %p983_p0 = scmp.lt.u32.totalorder %s975_s28, %s1275_s22 }
 0x2ba   : > { %p977_p4 = pnand %p976_p1, %p1351_p2 }
 0x2bb   : > { %p982_p13 = por %p981_p10, %p980_p9 }
 0x2bc   : > { %p978_p3 = pneg %p977_p4 }
 0x2bd   : > { %p984_p5 = por %p983_p0, %p982_p13 }
 0x2bf   : > { %p985_p6 = pnand %p984_p5, %p978_p3 }
 0x2c1   : > { %988 = shalt.err (!%p985_p6)
}
 0x2c2   : > { %817 = dma.vmem_to_hbm [thread:$0]  (%p1351_p2), %s668_s17, 32, %s1275_s22, %s653_s5  }
 0x2c3 PF: > { %p829_p7 = scmp.ge.s32.totalorder %s1059_s8, 2  ;;  %s679_s27 = sand.u32 1, %s1031_s24  }
 0x2c4   : > { %p1352_p8 = scmp.ne.s32.totalorder %s1344_s15, 0  ;;  %s680_s18 = scalar_lea.sflag [#allocation4], %s679_s27 }
 0x2c6   : > { %p824_p11 = pnand %p829_p7, %p1352_p8 }
 0x2c8   : > { %1026 = dma.done.wait (!%p824_p11), %s680_s18, 32  }
 0x2c9   : > { %1028 = vsyncadd (!%p824_p11), %s680_s18, 4294967264  ;;  %s21_s8 = sadd.s32 1, %s1059_s8   ;;  %s1353_s28 = sld [smem:[#allocation8_spill]] }
 0x2ca   : > { %p18_p12 = scmp.ge.s32.totalorder %s21_s8, 8   ;;  %s1354_s14 = sld [smem:[#allocation9_spill]] }
 0x2cb   : > { %s1355_s30 = sld [smem:[#allocation10_spill]]  ;;  %s1356_s24 = smov %s1035_s25 }
 0x2cc   : > { %s1357_s25 = smov %s1039_s26  ;;  %s1358_s26 = smov %s1188_s19 }
 0x2cd   : > { %s1359_s27 = smov %s1051_s29  ;;  %20 = sbr.rel (!%p18_p12) target bundleno = 8 (0x8), region = 96 }
 0x2d0   : > { %s1360_s29 = smov %s1354_s14 }
 0x2d4   :  { %685 = vsyncpa [#allocation3], 1 }
 0x2d5   :  { %687 = vsyncpa [#allocation3 + $0x1], 1 }
 0x2d6   :  { %688 = vsyncpa [#allocation4], 1 }
 0x2d7   :  { %690 = vsyncpa [#allocation4 + $0x1], 1 }

</bundles_post_ra>
